<compile_context>
chip_gen: v6e
topology: v6e:2x2x1
jax: 0.10.0
libtpu: 0.0.40
codegen_flags: <defaults>
</compile_context>

<pallas_src>
import math
import jax
import jax.numpy as jnp
from jax import lax
from jax.experimental import pallas as pl
from jax.experimental.pallas import tpu as pltpu

INPUT_SIZE = 36
HIDDEN_SIZES = [32, 16]          # module appends 1 -> [32, 16, 1]
LAYER_SIZES = HIDDEN_SIZES + [1]


def mlp_kernel(x_ref, w0_ref, b0_ref, w1_ref, b1_ref, w2_ref, b2_ref, o_ref):
    # Layer 0 on the MXU: bf16 x bf16 with f32 accumulation (x is the only
    # streamed operand, so bf16 halves HBM read traffic and avoids f32
    # multi-pass MXU emulation for the big matmul).
    h = jnp.dot(x_ref[...], w0_ref[...], preferred_element_type=jnp.float32)
    h = jnp.maximum(h + b0_ref[...], 0.0)
    # Layer 1: tiny, f32 weights (VMEM-resident), f32 accumulation.
    h = jnp.dot(h, w1_ref[...], preferred_element_type=jnp.float32)
    h = jnp.maximum(h + b1_ref[...], 0.0)
    # Final 16 -> 1 layer: contract the feature axis of h against the (1, 16)
    # weight row (NT dot_general, no explicit transpose).  Result is (1, tile):
    # the batch lands on the lane axis, so the store and the HBM writeback are
    # lane-dense (no (tile, 1) masked-column stores).
    out = lax.dot_general(w2_ref[...], h, (((1,), (1,)), ((), ())),
                          preferred_element_type=jnp.float32)      # (1, tile)
    o_ref[...] = jnp.maximum(out + b2_ref[...], 0.0).astype(o_ref.dtype)


def _round_up(n: int, m: int) -> int:
    return ((n + m - 1) // m) * m


def _choose_tile(B: int, tm: int):
    """Pick a 128-multiple batch tile.

    Goals: (a) large tile to amortize the ~0.35 us per-grid-step overhead,
    (b) minimal zero-padding of the batch, (c) an even block count with >=2
    blocks per TensorCore on large batches so v7x's two cores split evenly
    and each core still pipelines DMA behind compute.
    """
    tm = max(128, _round_up(tm, 128))
    n_min = pl.cdiv(B, tm)                 # blocks forced by the tile cap
    if B >= 4 * 512:
        n_target = max(n_min, 4)           # >= 2 steps per core on v7x
    elif B >= 2 * 512:
        n_target = max(n_min, 2)
    else:
        n_target = n_min                   # small batch: one block
    if n_target > 1 and n_target % 2 == 1:
        n_target += 1                      # even split across 2 TensorCores
    tile = _round_up(pl.cdiv(B, n_target), 128)
    n_blocks = pl.cdiv(B, tile)
    if n_blocks > 1 and n_blocks % 2 == 1:  # re-even after the 128 round-up
        tile = _round_up(pl.cdiv(B, n_blocks + 1), 128)
        n_blocks = pl.cdiv(B, tile)
    return tile, n_blocks


def net_forward(x, params, *, tm=8192):
    """Full MLP forward pass in a single Pallas kernel.

    x: [B, 36] float32 (or bfloat16)
    params: list of (W [in, out], b [1, out]) for the 3 layers (float32).
    tm: max batch rows per grid step (rounded to a multiple of 128).
    """
    B, D = x.shape
    assert D == INPUT_SIZE
    (w0, b0), (w1, b1), (w2, b2) = params
    # Final-layer weight as a (1, 16) row ([out, in]); w2 is (16, 1) so a
    # reshape is exactly the transpose.
    w2_row = jnp.reshape(w2, (1, w2.shape[0]))

    # bf16 for the streamed operand and its matching weight; later layers'
    # weights stay f32 (they are VMEM-resident, no HBM cost per step).
    x_lp = x.astype(jnp.bfloat16)
    w0_lp = w0.astype(jnp.bfloat16)

    tile, n_blocks = _choose_tile(B, tm)
    B_pad = tile * n_blocks
    if B_pad != B:
        x_lp = jnp.pad(x_lp, ((0, B_pad - B), (0, 0)))

    in_specs = [
        pl.BlockSpec((tile, D), lambda i: (i, 0)),        # x tile (streamed)
        # Constant (0, 0) block index -> weights/biases stay VMEM-resident
        # across grid steps (fetched once, no per-step re-DMA).
        pl.BlockSpec(w0_lp.shape, lambda i: (0, 0)),
        pl.BlockSpec(b0.shape, lambda i: (0, 0)),
        pl.BlockSpec(w1.shape, lambda i: (0, 0)),
        pl.BlockSpec(b1.shape, lambda i: (0, 0)),
        pl.BlockSpec(w2_row.shape, lambda i: (0, 0)),
        pl.BlockSpec(b2.shape, lambda i: (0, 0)),
    ]
    # Lane-dense output: one (1, tile) row per grid step, stored into a
    # (n_blocks, 1, tile) slab and reshaped back to (B, 1) outside the kernel.
    out_spec = pl.BlockSpec((None, 1, tile), lambda i: (i, 0, 0))

    out = pl.pallas_call(
        mlp_kernel,
        out_shape=jax.ShapeDtypeStruct((n_blocks, 1, tile), jnp.float32),
        grid_spec=pltpu.PrefetchScalarGridSpec(
            num_scalar_prefetch=0,
            grid=(n_blocks,),
            in_specs=in_specs,
            out_specs=out_spec,
        ),
        compiler_params=pltpu.CompilerParams(
            dimension_semantics=("parallel",),
            # Lane-padded footprint per step is roughly tile * 2 KiB (bf16 x
            # block double-buffered + f32 h0/h1 temps, all padded to 128
            # lanes): ~16 MiB at tile=8192.  48 MiB clears v5e's 16 MiB /
            # v6e-v7x's 32 MiB scoped defaults and stays under v7x's 64 MiB
            # physical VMEM.
            vmem_limit_bytes=48 * 1024 * 1024,
        ),
    )(x_lp, w0_lp, b0, w1, b1, w2_row, b2)
    return out.reshape(-1)[:B].reshape(B, 1)


def init_params(key):
    """Deterministic init mimicking nn.Linear's U(-1/sqrt(fan_in), 1/sqrt(fan_in))."""
    params = []
    fan_in = INPUT_SIZE
    for out_dim in LAYER_SIZES:
        key, kw, kb = jax.random.split(key, 3)
        bound = 1.0 / math.sqrt(fan_in)
        w = jax.random.uniform(kw, (fan_in, out_dim), jnp.float32, -bound, bound)
        b = jax.random.uniform(kb, (1, out_dim), jnp.float32, -bound, bound)
        params.append((w, b))
        fan_in = out_dim
    return params


def reference_forward(x, params):
    """Pure-f32 JAX reference (matches the PyTorch module)."""
    h = x
    for (w, b) in params:
        h = jnp.maximum(jnp.dot(h, w) + b, 0.0)
    return h


def reference_forward_matched(x, params):
    """Reference at the kernel's precision: layer-0 matmul in bf16, f32 accum."""
    (w0, b0) = params[0]
    h = jnp.dot(x.astype(jnp.bfloat16), w0.astype(jnp.bfloat16),
                preferred_element_type=jnp.float32)
    h = jnp.maximum(h + b0, 0.0)
    for (w, b) in params[1:]:
        h = jnp.maximum(jnp.dot(h, w) + b, 0.0)
    return h


if __name__ == "__main__":
    key = jax.random.PRNGKey(0)
    params = init_params(key)

    # B=8:   single 128-row tile (small-batch path, heavy padding sliced off).
    # B=300: single 384-row tile (ragged, zero-padded rows discarded).
    # B=1100: two 640-row tiles -> exercises the even 'parallel' multi-block
    #         grid (balanced across v7x's two TensorCores) plus padding.
    for B in (8, 300, 1100):
        key, kx = jax.random.split(key)
        x = jax.random.normal(kx, (B, INPUT_SIZE), jnp.float32)
        out = jax.block_until_ready(net_forward(x, params))
        assert out.shape == (B, 1), f"bad output shape {out.shape} for B={B}"
        ref_matched = reference_forward_matched(x, params)
        assert jnp.allclose(out, ref_matched, atol=1e-4, rtol=1e-4), \
            f"mismatch vs precision-matched JAX reference (B={B})"
        ref_f32 = reference_forward(x, params)
        assert jnp.allclose(out, ref_f32, atol=5e-2, rtol=5e-2), \
            f"mismatch vs f32 JAX reference (B={B})"

    print("KERNEL_OK")
</pallas_src>

<mosaic_0001>
module attributes {stable_mosaic.version = 11 : i64} {
  func.func @mlp_kernel(%arg0: i32, %arg1: memref<128x36xbf16, #tpu.memory_space<vmem>>, %arg2: memref<36x32xbf16, #tpu.memory_space<vmem>>, %arg3: memref<1x32xf32, #tpu.memory_space<vmem>>, %arg4: memref<32x16xf32, #tpu.memory_space<vmem>>, %arg5: memref<1x16xf32, #tpu.memory_space<vmem>>, %arg6: memref<1x16xf32, #tpu.memory_space<vmem>>, %arg7: memref<1x1xf32, #tpu.memory_space<vmem>>, %arg8: memref<1x1x128xf32, #tpu.memory_space<vmem>>) attributes {dimension_semantics = [#tpu.dimension_semantics<parallel>], iteration_bounds = array<i64: 1>, scalar_prefetch = 0 : i64, scratch_operands = 0 : i64, tpu.core_type = #tpu.core_type<tc>, window_params = [{transform_indices = @transform_0, window_bounds = array<i64: 128, 36>}, {pipeline_mode = #tpu.pipeline_mode<synchronous>, transform_indices = @transform_1, window_bounds = array<i64: 36, 32>}, {pipeline_mode = #tpu.pipeline_mode<synchronous>, transform_indices = @transform_2, window_bounds = array<i64: 1, 32>}, {pipeline_mode = #tpu.pipeline_mode<synchronous>, transform_indices = @transform_3, window_bounds = array<i64: 32, 16>}, {pipeline_mode = #tpu.pipeline_mode<synchronous>, transform_indices = @transform_4, window_bounds = array<i64: 1, 16>}, {pipeline_mode = #tpu.pipeline_mode<synchronous>, transform_indices = @transform_5, window_bounds = array<i64: 1, 16>}, {pipeline_mode = #tpu.pipeline_mode<synchronous>, transform_indices = @transform_6, window_bounds = array<i64: 1, 1>}, {transform_indices = @transform_7, window_bounds = array<i64: 1, 1, 128>}]} {
    %c0 = arith.constant 0 : index
    %c0_0 = arith.constant 0 : index
    %0 = vector.load %arg1[%c0, %c0_0] : memref<128x36xbf16, #tpu.memory_space<vmem>>, vector<128x36xbf16>
    %c0_1 = arith.constant 0 : index
    %c0_2 = arith.constant 0 : index
    %1 = vector.load %arg2[%c0_1, %c0_2] : memref<36x32xbf16, #tpu.memory_space<vmem>>, vector<36x32xbf16>
    %cst = arith.constant dense<0.000000e+00> : vector<128x32xf32>
    %2 = tpu.matmul %0, %1, %cst {dimension_numbers = #tpu.dot_dimension_numbers<[1], [0], [0], [1], [0, 0, 1, 1], [], []>} : vector<128x36xbf16>, vector<36x32xbf16>, vector<128x32xf32> -> vector<128x32xf32>
    %c0_3 = arith.constant 0 : index
    %c0_4 = arith.constant 0 : index
    %3 = vector.load %arg3[%c0_3, %c0_4] : memref<1x32xf32, #tpu.memory_space<vmem>>, vector<1x32xf32>
    %4 = vector.broadcast %3 : vector<1x32xf32> to vector<128x32xf32>
    %5 = arith.addf %2, %4 : vector<128x32xf32>
    %cst_5 = arith.constant 0.000000e+00 : f32
    %6 = vector.broadcast %cst_5 : f32 to vector<128x32xf32>
    %7 = arith.maximumf %5, %6 : vector<128x32xf32>
    %c0_6 = arith.constant 0 : index
    %c0_7 = arith.constant 0 : index
    %8 = vector.load %arg4[%c0_6, %c0_7] : memref<32x16xf32, #tpu.memory_space<vmem>>, vector<32x16xf32>
    %cst_8 = arith.constant dense<0.000000e+00> : vector<128x16xf32>
    %9 = tpu.matmul %7, %8, %cst_8 {dimension_numbers = #tpu.dot_dimension_numbers<[1], [0], [0], [1], [0, 0, 1, 1], [], []>} : vector<128x32xf32>, vector<32x16xf32>, vector<128x16xf32> -> vector<128x16xf32>
    %c0_9 = arith.constant 0 : index
    %c0_10 = arith.constant 0 : index
    %10 = vector.load %arg5[%c0_9, %c0_10] : memref<1x16xf32, #tpu.memory_space<vmem>>, vector<1x16xf32>
    %11 = vector.broadcast %10 : vector<1x16xf32> to vector<128x16xf32>
    %12 = arith.addf %9, %11 : vector<128x16xf32>
    %cst_11 = arith.constant 0.000000e+00 : f32
    %13 = vector.broadcast %cst_11 : f32 to vector<128x16xf32>
    %14 = arith.maximumf %12, %13 : vector<128x16xf32>
    %c0_12 = arith.constant 0 : index
    %c0_13 = arith.constant 0 : index
    %15 = vector.load %arg6[%c0_12, %c0_13] : memref<1x16xf32, #tpu.memory_space<vmem>>, vector<1x16xf32>
    %cst_14 = arith.constant dense<0.000000e+00> : vector<1x128xf32>
    %16 = tpu.matmul %15, %14, %cst_14 {dimension_numbers = #tpu.dot_dimension_numbers<[1], [1], [0], [0], [0, 0, 1, 0], [], []>} : vector<1x16xf32>, vector<128x16xf32>, vector<1x128xf32> -> vector<1x128xf32>
    %c0_15 = arith.constant 0 : index
    %c0_16 = arith.constant 0 : index
    %17 = vector.load %arg7[%c0_15, %c0_16] : memref<1x1xf32, #tpu.memory_space<vmem>>, vector<1x1xf32>
    %18 = vector.broadcast %17 : vector<1x1xf32> to vector<1x128xf32>
    %19 = arith.addf %16, %18 : vector<1x128xf32>
    %cst_17 = arith.constant 0.000000e+00 : f32
    %20 = vector.broadcast %cst_17 : f32 to vector<1x128xf32>
    %21 = arith.maximumf %19, %20 : vector<1x128xf32>
    %c0_18 = arith.constant 0 : index
    %c0_19 = arith.constant 0 : index
    %c0_20 = arith.constant 0 : index
    %22 = vector.load %arg8[%c0_18, %c0_19, %c0_20] : memref<1x1x128xf32, #tpu.memory_space<vmem>>, vector<1x1x128xf32>
    %23 = vector.shape_cast %22 : vector<1x1x128xf32> to vector<1x128xf32>
    %24 = vector.shape_cast %21 : vector<1x128xf32> to vector<1x1x128xf32>
    tpu.vector_store %arg8[%c0_18, %c0_19, %c0_20], %24 {strides = array<i32>} : memref<1x1x128xf32, #tpu.memory_space<vmem>>, vector<1x1x128xf32>,
    return
  }
  func.func @transform_0(%arg0: i32) -> (i32, i32) {
    %c0_i32 = arith.constant 0 : i32
    %c0_i32_0 = arith.constant 0 : i32
    return %arg0, %c0_i32 : i32, i32
  }
  func.func @transform_1(%arg0: i32) -> (i32, i32) {
    %c0_i32 = arith.constant 0 : i32
    %c0_i32_0 = arith.constant 0 : i32
    %c0_i32_1 = arith.constant 0 : i32
    return %c0_i32, %c0_i32_0 : i32, i32
  }
  func.func @transform_2(%arg0: i32) -> (i32, i32) {
    %c0_i32 = arith.constant 0 : i32
    %c0_i32_0 = arith.constant 0 : i32
    %c0_i32_1 = arith.constant 0 : i32
    return %c0_i32, %c0_i32_0 : i32, i32
  }
  func.func @transform_3(%arg0: i32) -> (i32, i32) {
    %c0_i32 = arith.constant 0 : i32
    %c0_i32_0 = arith.constant 0 : i32
    %c0_i32_1 = arith.constant 0 : i32
    return %c0_i32, %c0_i32_0 : i32, i32
  }
  func.func @transform_4(%arg0: i32) -> (i32, i32) {
    %c0_i32 = arith.constant 0 : i32
    %c0_i32_0 = arith.constant 0 : i32
    %c0_i32_1 = arith.constant 0 : i32
    return %c0_i32, %c0_i32_0 : i32, i32
  }
  func.func @transform_5(%arg0: i32) -> (i32, i32) {
    %c0_i32 = arith.constant 0 : i32
    %c0_i32_0 = arith.constant 0 : i32
    %c0_i32_1 = arith.constant 0 : i32
    return %c0_i32, %c0_i32_0 : i32, i32
  }
  func.func @transform_6(%arg0: i32) -> (i32, i32) {
    %c0_i32 = arith.constant 0 : i32
    %c0_i32_0 = arith.constant 0 : i32
    %c0_i32_1 = arith.constant 0 : i32
    return %c0_i32, %c0_i32_0 : i32, i32
  }
  func.func @transform_7(%arg0: i32) -> (i32, i32, i32) {
    %c0_i32 = arith.constant 0 : i32
    %c0_i32_0 = arith.constant 0 : i32
    %c0_i32_1 = arith.constant 0 : i32
    return %arg0, %c0_i32, %c0_i32_0 : i32, i32, i32
  }
}

</mosaic_0001>

<bundles_post_ra>
// kernel: tpu_custom_call.1
= control target key start
LH: loop header
LB: loop body
LE: loop exit
PB: predicated region body
PF: predicated region fallthrough
CT: control target
= control target key end

     0   :  { %s1026_s0 = inlined_call_operand.vmem [shape: bf16[128,36], index: 0, kind: input, shape index: {}]   ;;  %s1027_s1 = inlined_call_operand.vmem [shape: bf16[36,32], index: 1, kind: input, shape index: {}]   ;;  %s1028_s2 = inlined_call_operand.vmem [shape: f32[1,32], index: 2, kind: input, shape index: {}]   ;;  %s1029_s3 = inlined_call_operand.vmem [shape: f32[32,16], index: 3, kind: input, shape index: {}]   ;;  %s1030_s4 = inlined_call_operand.vmem [shape: f32[1,16], index: 4, kind: input, shape index: {}]   ;;  %s1031_s5 = inlined_call_operand.vmem [shape: f32[1,16], index: 5, kind: input, shape index: {}]   ;;  %s1032_s6 = inlined_call_operand.<no memory space> [shape: f32[1,1], index: 6, kind: input, shape index: {}]   ;;  %s1033_s7 = inlined_call_operand.hbm [shape: f32[1,1,128], index: 7, kind: output, shape index: {}]  }
   0x1   :  { %v12_v0 = vstv %s1032_s6 }
   0x2   :  { %13 = vst [vmem:[#allocation2] sm:$0x1] %v12_v0 }
   0x3   :  { %v822_v1 = vld [vmem:[%s1027_s1 + $0x10] ss:$0 sps:$4 sm:$0x33]   ;;  %vm138_vm0 = vcmask 1041408   ;;  %v823_v2 = vld [vmem:[%s1027_s1 + $0x8] sm:$0xff]   ;;  %vm113_vm1 = vcmask 293888  }
   0x4   :  { %816 = vmatprep.subr.msk.bf16.mxu0 %vm138_vm0, %v822_v1  ;;  %v140_v3 = vsel %vm138_vm0, %v822_v1, 0  ;;  %v825_v4 = vld [vmem:[%s1026_s0] sm:$0xff]   ;;  %v826_v6 = vld [vmem:[%s1026_s0 + $0x8] sm:$0xff]   ;;  %v827_v7 = vld [vmem:[%s1026_s0 + $0x10] sm:$0xff]  }
   0x5   :  { %728 = vmatpush3.bf16.msra.mxu0 %v140_v3  ;;  %v824_v5 = vld [vmem:[%s1027_s1] sm:$0xff]   ;;  %733 = vmatprep.mubr.msk.bf16.mxu0 %vm113_vm1, %v825_v4 }
   0x6   :  { %729 = vmatprep.subr.bf16.mxu0 %v823_v2 }
   0x9   :  { %730 = vmatpush3.bf16.msra.mxu0 %v823_v2 }
   0xa   :  { %731 = vmatprep.subr.bf16.mxu0 %v824_v5 }
   0xd   :  { %732 = vmatpush3.bf16.msra.mxu0 %v824_v5 }
   0xe   :  { %14 = vsyncpa [#allocation4], 0  ;;  %v828_v8 = vld [vmem:[%s1026_s0 + $0x18] sm:$0xff]   ;;  %v829_v9 = vld [vmem:[%s1026_s0 + $0x20] sm:$0xff]   ;;  %vm266_vm2 = vcmask 261120   ;;  %v855_v2 = vmov 0.0  }
   0xf   :  { %v830_v10 = vld [vmem:[%s1026_s0 + $0x28] sm:$0xff]   ;;  %v831_v11 = vld [vmem:[%s1026_s0 + $0x30] sm:$0xff]   ;;  %v832_v12 = vld [vmem:[%s1026_s0 + $0x38] sm:$0xff]   ;;  %vm856_vm3 = vmmov 0   ;;  %v857_v4 = vmov 0   ;;  %vm487_vm4 = vcmask 130048  }
  0x10   :  { %734 = vmatmul.mubr.msk.bf16.vlgmr.msra.gmra.mxu0 %vm113_vm1, %v826_v6  ;;  %v258_v13 = vld [vmem:[%s1029_s3 + $0x18] sm:$0xff]  ;;  %v257_v14 = vld [vmem:[%s1029_s3 + $0x10] sm:$0xff]  ;;  %v256_v15 = vld [vmem:[%s1029_s3 + $0x8] sm:$0xff]  ;;  %821 = vset.pattern.permute.xlu0 %v857_v4  ;;  %s858_s9 = smov [#allocation3]  }
  0x11   :  { %737 = vmatprep.mubr.msk.bf16.mxu0 %vm113_vm1, %v827_v7  ;;  %749 = vmatprep.subr.mxu1 %v258_v13  ;;  %v255_v16 = vld [vmem:[%s1029_s3] sm:$0xff]  ;;  %s617_s10 = sshll.u32 %s858_s9, 4  ;;  %s618_s10 = int_to_ptr.vmem [resolvable:$true] %s617_s10 }
  0x12   :  { %750 = vmatpush3.msra.mxu1 %v258_v13  ;;  %v625_v18 = vld [vmem:[%s1028_s2] ss:$0 sm:$0xff]  ;;  %s833_s11 = scalar_lea.vmem %s618_s10, 16  ;;  %s837_s12 = scalar_lea.vmem %s618_s10, 32 }
  0x13   :  { %751 = vmatprep.subr.mxu1 %v257_v14  ;;  %v477_v3 = vld [vmem:[#allocation2] sm:$0x1]  ;;  %p834_p0 = scmp.ne.s32.totalorder %s618_s10, %s833_s11  ;;  %p838_p1 = scmp.lt.s32.totalorder %s618_s10, %s618_s10 }
  0x14   :  { %752 = vmatpush3.msra.mxu1 %v257_v14  ;;  %480 = vperm.xlu0 %821, %v477_v3   ;;  %p839_p2 = scmp.lt.s32.totalorder %s837_s12, %s833_s11 }
  0x15   :  { %753 = vmatprep.subr.mxu1 %v256_v15 }
  0x16   :  { %754 = vmatpush3.msra.mxu1 %v256_v15  ;;  %p840_p3 = por %p839_p2, %p838_p1 }
  0x17   :  { %755 = vmatprep.subr.mxu1 %v255_v16 }
  0x18   :  { %738 = vmatmul.mubr.msk.bf16.gmra.mxu0 %vm113_vm1, %v828_v8  ;;  %756 = vmatpush3.msra.mxu1 %v255_v16  ;;  %p841_p4 = pnand %p840_p3, %p834_p0 }
  0x19   :  { %741 = vmatprep.mubr.msk.bf16.mxu0 %vm113_vm1, %v829_v9  ;;  %781 = vmatprep.subr.mxu1 %v855_v2 }
  0x20   :  { %742 = vmatmul.mubr.msk.bf16.gmra.mxu0 %vm113_vm1, %v830_v10 }
  0x21   :  { %745 = vmatprep.mubr.msk.bf16.mxu0 %vm113_vm1, %v831_v11 }
  0x28   :  { %746 = vmatmul.mubr.msk.bf16.gmra.mxu0 %vm113_vm1, %v832_v12 }
  0xd0   :  { %v735_v17 = vpop.f32.mrf.mxu0 }
  0xd1   :  { %v185_v23 = vadd.f32 %v735_v17, %v625_v18 }
  0xd2   :  { %v176_v19 = vpop.f32.mrf.mxu0 }
  0xd3   :  { %v177_v20 = vadd.f32 %v625_v18, %v176_v19  ;;  %v241_v29 = vmax.f32 %v185_v23, 0.0  ;;  %v645_v19 = vld [vmem:[%s1030_s4] ss:$0 sm:$0xff] }
  0xd4   :  { %v736_v21 = vpop.f32.mrf.mxu0 }
  0xd5   :  { %v239_v22 = vmax.f32 %v177_v20, 0.0  ;;  %v188_v27 = vadd.f32 %v736_v21, %v625_v18 }
  0xd6   :  { %v179_v24 = vpop.f32.mrf.mxu0 }
  0xd7   :  { %v180_v25 = vadd.f32 %v625_v18, %v179_v24  ;;  %757 = vmatprep.mubr.msk.f32.mxu1 %vm266_vm2, %v239_v22  ;;  %v242_v33 = vmax.f32 %v188_v27, 0.0 }
  0xd8   :  { %v739_v26 = vpop.f32.mrf.mxu0 }
  0xd9   :  { %v240_v28 = vmax.f32 %v180_v25, 0.0  ;;  %v201_v35 = vadd.f32 %v739_v26, %v625_v18 }
  0xda   :  { %v192_v30 = vpop.f32.mrf.mxu0 }
  0xdb   :  { %v193_v31 = vadd.f32 %v625_v18, %v192_v30  ;;  %758 = vmatmul.mubr.msk.f32.vlgmr.msra.gmra.mxu1 %vm266_vm2, %v240_v28  ;;  %v245_v41 = vmax.f32 %v201_v35, 0.0 }
  0xdc   :  { %v740_v32 = vpop.f32.mrf.mxu0  ;;  %760 = vmatprep.mubr.msk.f32.mxu1 %vm266_vm2, %v241_v29 }
  0xdd   :  { %v243_v34 = vmax.f32 %v193_v31, 0.0  ;;  %v204_v39 = vadd.f32 %v740_v32, %v625_v18 }
  0xde   :  { %v195_v36 = vpop.f32.mrf.mxu0 }
  0xdf   :  { %v196_v37 = vadd.f32 %v625_v18, %v195_v36  ;;  %761 = vmatmul.mubr.msk.f32.gmra.mxu1 %vm266_vm2, %v242_v33  ;;  %v246_v45 = vmax.f32 %v204_v39, 0.0 }
  0xe0   :  { %v743_v38 = vpop.f32.mrf.mxu0  ;;  %763 = vmatprep.mubr.msk.f32.mxu1 %vm266_vm2, %v243_v34 }
  0xe1   :  { %v244_v40 = vmax.f32 %v196_v37, 0.0  ;;  %v217_v47 = vadd.f32 %v743_v38, %v625_v18 }
  0xe2   :  { %v208_v42 = vpop.f32.mrf.mxu0 }
  0xe3   :  { %v209_v43 = vadd.f32 %v625_v18, %v208_v42  ;;  %764 = vmatmul.mubr.msk.f32.gmra.mxu1 %vm266_vm2, %v244_v40  ;;  %v249_v53 = vmax.f32 %v217_v47, 0.0 }
  0xe4   :  { %v744_v44 = vpop.f32.mrf.mxu0  ;;  %766 = vmatprep.mubr.msk.f32.mxu1 %vm266_vm2, %v245_v41 }
  0xe5   :  { %v247_v46 = vmax.f32 %v209_v43, 0.0  ;;  %v220_v51 = vadd.f32 %v744_v44, %v625_v18 }
  0xe6   :  { %v211_v48 = vpop.f32.mrf.mxu0 }
  0xe7   :  { %v212_v49 = vadd.f32 %v625_v18, %v211_v48  ;;  %767 = vmatmul.mubr.msk.f32.gmra.mxu1 %vm266_vm2, %v246_v45  ;;  %v250_v57 = vmax.f32 %v220_v51, 0.0 }
  0xe8   :  { %v747_v50 = vpop.f32.mrf.mxu0  ;;  %769 = vmatprep.mubr.msk.f32.mxu1 %vm266_vm2, %v247_v46 }
  0xe9   :  { %v248_v52 = vmax.f32 %v212_v49, 0.0  ;;  %v233_v59 = vadd.f32 %v747_v50, %v625_v18 }
  0xea   :  { %v224_v54 = vpop.f32.mrf.mxu0 }
  0xeb   :  { %v225_v55 = vadd.f32 %v625_v18, %v224_v54  ;;  %770 = vmatmul.mubr.msk.f32.gmra.mxu1 %vm266_vm2, %v248_v52  ;;  %v253_v0 = vmax.f32 %v233_v59, 0.0  ;;  %v476_v54 = vld [vmem:[%s1031_s5] sm:$0x1] }
  0xec   :  { %v748_v56 = vpop.f32.mrf.mxu0  ;;  %772 = vmatprep.mubr.msk.f32.mxu1 %vm266_vm2, %v249_v53 }
  0xed   :  { %v251_v58 = vmax.f32 %v225_v55, 0.0  ;;  %v236_v62 = vadd.f32 %v748_v56, %v625_v18  ;;  %v483_v55 = vlaneseq }
  0xee   :  { %v227_v60 = vpop.f32.mrf.mxu0 }
  0xef   :  { %v228_v61 = vadd.f32 %v625_v18, %v227_v60  ;;  %773 = vmatmul.mubr.msk.f32.gmra.mxu1 %vm266_vm2, %v250_v57  ;;  %v254_v1 = vmax.f32 %v236_v62, 0.0  ;;  %v484_v56 = vshrl.u32 %v483_v55, 7 }
  0xf0   :  { %775 = vmatprep.mubr.msk.f32.mxu1 %vm266_vm2, %v251_v58  ;;  %v481_v58 = vpop.permute.xlu0 %480 }
  0xf1   :  { %v252_v63 = vmax.f32 %v228_v61, 0.0  ;;  %v485_v57 = vsub.s32 0, %v484_v56 }
  0xf3   :  { %776 = vmatmul.mubr.msk.f32.gmra.mxu1 %vm266_vm2, %v252_v63  ;;  %v486_v59 = vrot.slane %v481_v58, %v485_v57 }
  0xf4   :  { %778 = vmatprep.mubr.msk.f32.mxu1 %vm266_vm2, %v253_v0 }
  0xf7   :  { %779 = vmatmul.mubr.msk.f32.gmra.mxu1 %vm266_vm2, %v254_v1 }
  0xf8   :  { %813 = vmatprep.mubr.msk.f32.mxu1 %vm856_vm3, %v855_v2 }
 0x19b   :  { %v976_v5 = vpop.f32.mrf.mxu1 }
 0x19c   :  { %v387_v49 = vadd.f32 %v976_v5, %v645_v19 }
 0x19d   :  { %v978_v6 = vpop.f32.mrf.mxu1 }
 0x19e   :  { %v461_v51 = vmax.f32 %v387_v49, 0.0  ;;  %v382_v52 = vadd.f32 %v645_v19, %v978_v6 }
 0x19f   :  { %v762_v7 = vpop.f32.mrf.mxu1 }
 0x1a0   :  { %v397_v45 = vadd.f32 %v762_v7, %v645_v19  ;;  %v460_v53 = vmax.f32 %v382_v52, 0.0 }
 0x1a1   :  { %v980_v8 = vpop.f32.mrf.mxu1 }
 0x1a2   :  { %v463_v47 = vmax.f32 %v397_v45, 0.0  ;;  %v392_v48 = vadd.f32 %v645_v19, %v980_v8 }
 0x1a3   :  { %v765_v9 = vpop.f32.mrf.mxu1 }
 0x1a4   :  { %v407_v41 = vadd.f32 %v765_v9, %v645_v19  ;;  %v462_v50 = vmax.f32 %v392_v48, 0.0 }
 0x1a5   :  { %v401_v10 = vpop.f32.mrf.mxu1 }
 0x1a6   :  { %v465_v43 = vmax.f32 %v407_v41, 0.0  ;;  %v402_v44 = vadd.f32 %v645_v19, %v401_v10 }
 0x1a7   :  { %v768_v11 = vpop.f32.mrf.mxu1 }
 0x1a8   :  { %v417_v37 = vadd.f32 %v768_v11, %v645_v19  ;;  %v464_v46 = vmax.f32 %v402_v44, 0.0 }
 0x1a9   :  { %v411_v12 = vpop.f32.mrf.mxu1 }
 0x1aa   :  { %v467_v39 = vmax.f32 %v417_v37, 0.0  ;;  %v412_v40 = vadd.f32 %v645_v19, %v411_v12 }
 0x1ab   :  { %v771_v13 = vpop.f32.mrf.mxu1 }
 0x1ac   :  { %v427_v33 = vadd.f32 %v771_v13, %v645_v19  ;;  %v466_v42 = vmax.f32 %v412_v40, 0.0 }
 0x1ad   :  { %v421_v14 = vpop.f32.mrf.mxu1 }
 0x1ae   :  { %v469_v35 = vmax.f32 %v427_v33, 0.0  ;;  %v422_v36 = vadd.f32 %v645_v19, %v421_v14 }
 0x1af   :  { %v774_v15 = vpop.f32.mrf.mxu1 }
 0x1b0   :  { %v437_v29 = vadd.f32 %v774_v15, %v645_v19  ;;  %v468_v38 = vmax.f32 %v422_v36, 0.0 }
 0x1b1   :  { %v431_v16 = vpop.f32.mrf.mxu1 }
 0x1b2   :  { %v471_v31 = vmax.f32 %v437_v29, 0.0  ;;  %v432_v32 = vadd.f32 %v645_v19, %v431_v16 }
 0x1b3   :  { %v777_v17 = vpop.f32.mrf.mxu1 }
 0x1b4   :  { %v447_v25 = vadd.f32 %v777_v17, %v645_v19  ;;  %v470_v34 = vmax.f32 %v432_v32, 0.0 }
 0x1b5   :  { %v441_v18 = vpop.f32.mrf.mxu1 }
 0x1b6   :  { %v473_v27 = vmax.f32 %v447_v25, 0.0  ;;  %v442_v28 = vadd.f32 %v645_v19, %v441_v18 }
 0x1b7   :  { %v780_v20 = vpop.f32.mrf.mxu1 }
 0x1b8   :  { %v457_v21 = vadd.f32 %v780_v20, %v645_v19  ;;  %v472_v30 = vmax.f32 %v442_v28, 0.0 }
 0x1b9   :  { %v451_v22 = vpop.f32.mrf.mxu1 }
 0x1ba   :  { %v475_v23 = vmax.f32 %v457_v21, 0.0  ;;  %v452_v24 = vadd.f32 %v645_v19, %v451_v22 }
 0x1bc   :  { %782 = vmatpush3.xpose.msk.msra.mxu1 %vm487_vm4, %v475_v23  ;;  %v474_v26 = vmax.f32 %v452_v24, 0.0 }
 0x1bd   :  { %783 = vmatprep.subr.mxu1 %v855_v2 }
 0x1c0   :  { %784 = vmatpush3.xpose.msk.msra.mxu1 %vm487_vm4, %v474_v26 }
 0x1c1   :  { %785 = vmatprep.subr.mxu1 %v855_v2 }
 0x1c4   :  { %786 = vmatpush3.xpose.msk.msra.mxu1 %vm487_vm4, %v473_v27 }
 0x1c5   :  { %787 = vmatprep.subr.mxu1 %v855_v2 }
 0x1c8   :  { %788 = vmatpush3.xpose.msk.msra.mxu1 %vm487_vm4, %v472_v30 }
 0x1c9   :  { %789 = vmatprep.subr.mxu1 %v855_v2 }
 0x1cc   :  { %790 = vmatpush3.xpose.msk.msra.mxu1 %vm487_vm4, %v471_v31 }
 0x1cd   :  { %791 = vmatprep.subr.mxu1 %v855_v2 }
 0x1d0   :  { %792 = vmatpush3.xpose.msk.msra.mxu1 %vm487_vm4, %v470_v34 }
 0x1d1   :  { %793 = vmatprep.subr.mxu1 %v855_v2 }
 0x1d4   :  { %794 = vmatpush3.xpose.msk.msra.mxu1 %vm487_vm4, %v469_v35 }
 0x1d5   :  { %795 = vmatprep.subr.mxu1 %v855_v2 }
 0x1d8   :  { %796 = vmatpush3.xpose.msk.msra.mxu1 %vm487_vm4, %v468_v38 }
 0x1d9   :  { %797 = vmatprep.subr.mxu1 %v855_v2 }
 0x1dc   :  { %798 = vmatpush3.xpose.msk.msra.mxu1 %vm487_vm4, %v467_v39 }
 0x1dd   :  { %799 = vmatprep.subr.mxu1 %v855_v2 }
 0x1e0   :  { %800 = vmatpush3.xpose.msk.msra.mxu1 %vm487_vm4, %v466_v42 }
 0x1e1   :  { %801 = vmatprep.subr.mxu1 %v855_v2 }
 0x1e4   :  { %802 = vmatpush3.xpose.msk.msra.mxu1 %vm487_vm4, %v465_v43 }
 0x1e5   :  { %803 = vmatprep.subr.mxu1 %v855_v2 }
 0x1e8   :  { %804 = vmatpush3.xpose.msk.msra.mxu1 %vm487_vm4, %v464_v46 }
 0x1e9   :  { %805 = vmatprep.subr.mxu1 %v855_v2 }
 0x1ec   :  { %806 = vmatpush3.xpose.msk.msra.mxu1 %vm487_vm4, %v463_v47 }
 0x1ed   :  { %807 = vmatprep.subr.mxu1 %v855_v2 }
 0x1f0   :  { %808 = vmatpush3.xpose.msk.msra.mxu1 %vm487_vm4, %v462_v50 }
 0x1f1   :  { %809 = vmatprep.subr.mxu1 %v855_v2 }
 0x1f4   :  { %810 = vmatpush3.xpose.msk.msra.mxu1 %vm487_vm4, %v461_v51 }
 0x1f5   :  { %811 = vmatprep.subr.mxu1 %v855_v2 }
 0x1f8   :  { %812 = vmatpush3.xpose.msk.msra.mxu1 %vm487_vm4, %v460_v53 }
 0x1fb   :  { %814 = vmatmul.mubr.msk.f32.vlgmr.msra.gmra.mxu1 %vm487_vm4, %v476_v54 }
 0x2bb   :  { %v605_v60 = vpop.f32.mrf.mxu1 }
 0x2bc   :  { %v606_v61 = vadd.f32 %v605_v60, %v486_v59 }
 0x2bd   :  { %v815_v62 = vpop.f32.mrf.mxu1 }
 0x2be   :  { %v609_v63 = vmax.f32 %v606_v61, 0.0 }
 0x2c0   :  { %610 = vst [vmem:[#allocation3] sm:$0x1] %v609_v63 }
 0x2c1   :  { %844 = shalt.err (!%p841_p4)
}
 0x2c2   :  { %620 = dma.vmem_to_hbm [thread:$0]  %s618_s10, 16, %s1033_s7, [#allocation4]  }
 0x2c3   :  { %853 = dma.done.wait [#allocation4], 16  }
 0x2c4   :  { %854 = vsyncadd [#allocation4], 4294967280 }
 0x2c5   :  { %624 = vsyncpa [#allocation4], 1 }

</bundles_post_ra>
